<compile_context>
chip_gen: v7x
topology: tpu7x:2x2x1
jax: 0.10.0
libtpu: 0.0.40
codegen_flags: <defaults>
</compile_context>

<pallas_src>
import jax
import jax.numpy as jnp
from jax.experimental import pallas as pl
from jax.experimental.pallas import tpu as pltpu


# ----------------------------- Pallas kernel -------------------------------

def _triplet_mlp_kernel(x_ref, seg_ref, invc_ref,
                        w1_ref, b1_ref,
                        w2_ref, b2_ref,
                        w3_ref, b3_ref,
                        w4_ref, b4_ref,
                        w5_ref, b5_ref,
                        ctx_ref):
    """5x (Linear+ReLU) on a row tile + in-kernel segment-mean accumulation."""
    i = pl.program_id(0)

    @pl.when(i == 0)
    def _init():
        ctx_ref[...] = jnp.zeros_like(ctx_ref)

    # ---- layer 1: the [in, out, out-in] triplet is pre-folded into w1 and the
    #      in/out embeds are pre-concatenated -> one wide matmul ----
    x = x_ref[...]                                       # bf16 [tile_n, F2_pad]
    h = jnp.dot(x, w1_ref[...], preferred_element_type=jnp.float32)
    h = jnp.maximum(h + b1_ref[...], 0.0)                # f32 bias + ReLU

    # ---- layers 2..5 (bf16 matmul inputs, f32 accumulation) ----
    for w_ref, b_ref in ((w2_ref, b2_ref), (w3_ref, b3_ref),
                         (w4_ref, b4_ref), (w5_ref, b5_ref)):
        h = jnp.dot(h.astype(jnp.bfloat16), w_ref[...],
                    preferred_element_type=jnp.float32)
        h = jnp.maximum(h + b_ref[...], 0.0)

    # ---- segment mean: scaled one-hot built in-kernel, accumulated into out ----
    tile_n = h.shape[0]
    b_pad = ctx_ref.shape[0]
    seg_ids = seg_ref[...]                               # [tile_n, 1] int32 (-1 = pad)
    col = jax.lax.broadcasted_iota(jnp.int32, (tile_n, b_pad), 1)
    # select fuses the 1/count scale: rows with seg == -1 (padding) contribute 0
    onehot = jnp.where(col == seg_ids, invc_ref[...], 0.0)   # [tile_n, b_pad] f32
    ctx_ref[...] += jax.lax.dot_general(
        onehot, h,
        dimension_numbers=(((0,), (0,)), ((), ())),      # contract over rows
        preferred_element_type=jnp.float32)              # [b_pad, D_pad]


# ------------------------------- wrapper ------------------------------------

def _round_up(x, m):
    return (x + m - 1) // m * m


def _pad2(x, rows, cols, dtype):
    x = x.astype(dtype)
    return jnp.pad(x, ((0, rows - x.shape[0]), (0, cols - x.shape[1])))


def _row_spec(shape):
    return pl.BlockSpec(shape, lambda i: (i, 0))


def _const_spec(shape):
    return pl.BlockSpec(shape, lambda i: (0, 0))


def triplet_io_embed_forward(padded_i, padded_o, scatter_idx, params,
                             num_programs, tile_n=None):
    """Embedding gather glue + tiled Pallas MLP/segment-mean kernel."""
    emb = params["tok_embed"]                            # [V, 4] f32
    N, L = padded_i.shape
    tok_dim = emb.shape[1]
    F = L * tok_dim                                      # 4*L per side
    D = params["w5"].shape[1]
    B = num_programs

    # ---- embedding gather (plain JAX glue) ----
    in_e = emb[padded_i].reshape(N, F)
    out_e = emb[padded_o].reshape(N, F)
    x_cat = jnp.concatenate([in_e, out_e], axis=-1)      # [N, 2F]

    # ---- fold the triplet concat into layer-1 weights ----
    #   h1 = in@Wa + out@Wb + (out-in)@Wc = in@(Wa-Wc) + out@(Wb+Wc)
    w1 = params["w1"]                                    # [3F, D]
    w1_in = w1[:F] - w1[2 * F:]
    w1_out = w1[F:2 * F] + w1[2 * F:]
    w1_cat = jnp.concatenate([w1_in, w1_out], axis=0)    # [2F, D]

    # ---- padding to TPU-friendly shapes ----
    F2 = 2 * F
    F2_pad = _round_up(F2, 128)
    D_pad = _round_up(D, 128)
    B_pad = _round_up(max(B, 1), 8)

    if tile_n is None:
        tile_n = _round_up(N, 8) if N <= 512 else 512
    tile_n = min(_round_up(tile_n, 8), _round_up(N, 8))
    N_pad = _round_up(N, tile_n)
    grid = (N_pad // tile_n,)

    x_p = _pad2(x_cat, N_pad, F2_pad, jnp.bfloat16)

    seg = jnp.full((N_pad,), -1, jnp.int32).at[:N].set(
        scatter_idx.astype(jnp.int32)).reshape(N_pad, 1)
    counts = jnp.zeros((B_pad,), jnp.float32).at[scatter_idx].add(1.0)
    inv_counts = (1.0 / jnp.maximum(counts, 1.0)).reshape(1, B_pad)

    w1p = _pad2(w1_cat, F2_pad, D_pad, jnp.bfloat16)
    wts = [_pad2(params[f"w{k}"], D_pad, D_pad, jnp.bfloat16) for k in (2, 3, 4, 5)]
    bss = [_pad2(params[f"b{k}"], 1, D_pad, jnp.float32) for k in (1, 2, 3, 4, 5)]

    in_specs = [
        _row_spec((tile_n, F2_pad)),       # concatenated [in|out] embed tile
        _row_spec((tile_n, 1)),            # scatter ids tile
        _const_spec((1, B_pad)),           # inv counts (resident)
        _const_spec((F2_pad, D_pad)),      # folded w1
        _const_spec((1, D_pad)),           # b1
        _const_spec((D_pad, D_pad)), _const_spec((1, D_pad)),   # w2, b2
        _const_spec((D_pad, D_pad)), _const_spec((1, D_pad)),   # w3, b3
        _const_spec((D_pad, D_pad)), _const_spec((1, D_pad)),   # w4, b4
        _const_spec((D_pad, D_pad)), _const_spec((1, D_pad)),   # w5, b5
    ]
    out_spec = _const_spec((B_pad, D_pad))  # resident accumulator across the grid

    flops = 2 * N_pad * (F2_pad * D_pad + 4 * D_pad * D_pad) \
        + 2 * N_pad * B_pad * D_pad
    bytes_accessed = (N_pad * F2_pad * 2 + N_pad * 4
                      + F2_pad * D_pad * 2 + 4 * D_pad * D_pad * 2
                      + 5 * D_pad * 4 + B_pad * 4 + B_pad * D_pad * 4)
    cost = pl.CostEstimate(flops=int(flops), transcendentals=0,
                           bytes_accessed=int(bytes_accessed))

    vmem_bytes = (2 * (tile_n * F2_pad * 2 + tile_n * 4)             # streamed tiles, 2 bufs
                  + 2 * (F2_pad * D_pad * 2 + 4 * D_pad * D_pad * 2)  # resident weights
                  + 2 * (5 * D_pad * 4 + B_pad * 4)
                  + B_pad * D_pad * 4
                  + 8 * tile_n * D_pad * 4)                           # activation headroom
    vmem_limit = int(min(max(vmem_bytes, 8 * 2 ** 20), 48 * 2 ** 20))

    ctx_pad = pl.pallas_call(
        _triplet_mlp_kernel,
        out_shape=jax.ShapeDtypeStruct((B_pad, D_pad), jnp.float32),
        grid=grid,
        in_specs=in_specs,
        out_specs=out_spec,
        compiler_params=pltpu.CompilerParams(
            dimension_semantics=("arbitrary",),        # reduction axis (accumulator)
            vmem_limit_bytes=vmem_limit),
        cost_estimate=cost,
    )(x_p, seg, inv_counts,
      w1p, bss[0],
      wts[0], bss[1], wts[1], bss[2], wts[2], bss[3], wts[3], bss[4])

    # forward() returns (None, None, ctx_embed)
    return None, None, ctx_pad[:B, :D]


# ------------------------- deterministic parameters -------------------------

def init_params(key, vocab_size, tok_dim, max_output_len, embed_dim):
    f_in = tok_dim * 3 * max_output_len
    dims = [f_in] + [embed_dim] * 5
    keys = jax.random.split(key, 1 + 2 * 5)
    params = {"tok_embed": jax.random.normal(keys[0], (vocab_size, tok_dim), jnp.float32)}
    for li in range(5):
        fan_in, fan_out = dims[li], dims[li + 1]
        bound = 1.0 / jnp.sqrt(jnp.float32(fan_in))
        params[f"w{li + 1}"] = jax.random.uniform(
            keys[1 + 2 * li], (fan_in, fan_out), jnp.float32, -bound, bound)
        params[f"b{li + 1}"] = jax.random.uniform(
            keys[2 + 2 * li], (1, fan_out), jnp.float32, -bound, bound)
    return params


# --------------------------------- main -------------------------------------

if __name__ == "__main__":
    # Small shapes consistent with the module:
    #   B = 2 programs, numPublicIO = 5 -> N = 10 IO pairs (two row-tiles of 8
    #   with padded rows exercise the grid accumulator + pad masking)
    #   maxOutputLength L = 8, token embed dim = 4 (fixed by module), embed_dim = 32
    B, NUM_PUBLIC_IO = 2, 5
    N = B * NUM_PUBLIC_IO
    L, TOK_DIM, EMBED_DIM, VOCAB = 8, 4, 32, 20

    key = jax.random.PRNGKey(0)
    k_par, k_in, k_out = jax.random.split(key, 3)
    params = init_params(k_par, VOCAB, TOK_DIM, L, EMBED_DIM)

    padded_i = jax.random.randint(k_in, (N, L), 0, VOCAB, dtype=jnp.int32)
    padded_o = jax.random.randint(k_out, (N, L), 0, VOCAB, dtype=jnp.int32)
    scatter_idx = jnp.repeat(jnp.arange(B, dtype=jnp.int32), NUM_PUBLIC_IO)

    fwd = jax.jit(lambda pi, po, si: triplet_io_embed_forward(
        pi, po, si, params, num_programs=B, tile_n=8)[2])
    ctx_embed = jax.block_until_ready(fwd(padded_i, padded_o, scatter_idx))
    assert ctx_embed.shape == (B, EMBED_DIM)

    # --- reference matching kernel numerics (bf16 matmul inputs, f32 accum) ---
    def ref_bf16():
        ie = params["tok_embed"][padded_i].reshape(N, -1)
        oe = params["tok_embed"][padded_o].reshape(N, -1)
        F = ie.shape[1]
        w1 = params["w1"]
        w1a = (w1[:F] - w1[2 * F:]).astype(jnp.bfloat16)
        w1b = (w1[F:2 * F] + w1[2 * F:]).astype(jnp.bfloat16)
        h = (jnp.dot(ie.astype(jnp.bfloat16), w1a, preferred_element_type=jnp.float32)
             + jnp.dot(oe.astype(jnp.bfloat16), w1b, preferred_element_type=jnp.float32))
        h = jnp.maximum(h + params["b1"], 0.0)
        for li in (2, 3, 4, 5):
            h = jnp.dot(h.astype(jnp.bfloat16), params[f"w{li}"].astype(jnp.bfloat16),
                        preferred_element_type=jnp.float32)
            h = jnp.maximum(h + params[f"b{li}"], 0.0)
        seg = (scatter_idx[None, :] == jnp.arange(B)[:, None]).astype(jnp.float32)
        return (seg @ h) / jnp.maximum(seg.sum(1, keepdims=True), 1.0)

    # --- pure f32 reference of the original module semantics ---
    def ref_f32():
        ie = params["tok_embed"][padded_i].reshape(N, -1)
        oe = params["tok_embed"][padded_o].reshape(N, -1)
        h = jnp.concatenate([ie, oe, oe - ie], axis=-1)
        for li in range(1, 6):
            h = jnp.maximum(h @ params[f"w{li}"] + params[f"b{li}"], 0.0)
        seg = (scatter_idx[None, :] == jnp.arange(B)[:, None]).astype(jnp.float32)
        return (seg @ h) / jnp.maximum(seg.sum(1, keepdims=True), 1.0)

    r16 = jax.block_until_ready(ref_bf16())
    r32 = jax.block_until_ready(ref_f32())
    assert jnp.allclose(ctx_embed, r16, atol=2e-3, rtol=2e-3), "mismatch vs bf16-matched reference"
    assert jnp.allclose(ctx_embed, r32, atol=5e-2, rtol=5e-2), "mismatch vs f32 reference"

    print("KERNEL_OK")
</pallas_src>

<mosaic_0001>
module attributes {stable_mosaic.version = 11 : i64} {
  func.func @_triplet_mlp_kernel(%arg0: i32, %arg1: memref<8x128xbf16, #tpu.memory_space<vmem>>, %arg2: memref<8x1xi32, #tpu.memory_space<vmem>>, %arg3: memref<1x8xf32, #tpu.memory_space<vmem>>, %arg4: memref<128x128xbf16, #tpu.memory_space<vmem>>, %arg5: memref<1x128xf32, #tpu.memory_space<vmem>>, %arg6: memref<128x128xbf16, #tpu.memory_space<vmem>>, %arg7: memref<1x128xf32, #tpu.memory_space<vmem>>, %arg8: memref<128x128xbf16, #tpu.memory_space<vmem>>, %arg9: memref<1x128xf32, #tpu.memory_space<vmem>>, %arg10: memref<128x128xbf16, #tpu.memory_space<vmem>>, %arg11: memref<1x128xf32, #tpu.memory_space<vmem>>, %arg12: memref<128x128xbf16, #tpu.memory_space<vmem>>, %arg13: memref<1x128xf32, #tpu.memory_space<vmem>>, %arg14: memref<8x128xf32, #tpu.memory_space<vmem>>) attributes {dimension_semantics = [#tpu.dimension_semantics<arbitrary>], iteration_bounds = array<i64: 2>, scalar_prefetch = 0 : i64, scratch_operands = 0 : i64, tpu.core_type = #tpu.core_type<tc>, window_params = [{transform_indices = @transform_0, window_bounds = array<i64: 8, 128>}, {transform_indices = @transform_1, window_bounds = array<i64: 8, 1>}, {pipeline_mode = #tpu.pipeline_mode<synchronous>, transform_indices = @transform_2, window_bounds = array<i64: 1, 8>}, {pipeline_mode = #tpu.pipeline_mode<synchronous>, transform_indices = @transform_3, window_bounds = array<i64: 128, 128>}, {pipeline_mode = #tpu.pipeline_mode<synchronous>, transform_indices = @transform_4, window_bounds = array<i64: 1, 128>}, {pipeline_mode = #tpu.pipeline_mode<synchronous>, transform_indices = @transform_5, window_bounds = array<i64: 128, 128>}, {pipeline_mode = #tpu.pipeline_mode<synchronous>, transform_indices = @transform_6, window_bounds = array<i64: 1, 128>}, {pipeline_mode = #tpu.pipeline_mode<synchronous>, transform_indices = @transform_7, window_bounds = array<i64: 128, 128>}, {pipeline_mode = #tpu.pipeline_mode<synchronous>, transform_indices = @transform_8, window_bounds = array<i64: 1, 128>}, {pipeline_mode = #tpu.pipeline_mode<synchronous>, transform_indices = @transform_9, window_bounds = array<i64: 128, 128>}, {pipeline_mode = #tpu.pipeline_mode<synchronous>, transform_indices = @transform_10, window_bounds = array<i64: 1, 128>}, {pipeline_mode = #tpu.pipeline_mode<synchronous>, transform_indices = @transform_11, window_bounds = array<i64: 128, 128>}, {pipeline_mode = #tpu.pipeline_mode<synchronous>, transform_indices = @transform_12, window_bounds = array<i64: 1, 128>}, {pipeline_mode = #tpu.pipeline_mode<synchronous>, transform_indices = @transform_13, window_bounds = array<i64: 8, 128>}]} {
    %c0_i32 = arith.constant 0 : i32
    %0 = arith.cmpi eq, %arg0, %c0_i32 : i32
    %1 = arith.extui %0 : i1 to i32
    %c0_i32_0 = arith.constant 0 : i32
    %2 = arith.cmpi ne, %1, %c0_i32_0 : i32
    scf.if %2 {
      %cst_41 = arith.constant 0.000000e+00 : f32
      %56 = vector.broadcast %cst_41 : f32 to vector<8x128xf32>
      %c0_42 = arith.constant 0 : index
      %c0_43 = arith.constant 0 : index
      %57 = vector.load %arg14[%c0_42, %c0_43] : memref<8x128xf32, #tpu.memory_space<vmem>>, vector<8x128xf32>
      tpu.vector_store %arg14[%c0_42, %c0_43], %56 {strides = array<i32>} : memref<8x128xf32, #tpu.memory_space<vmem>>, vector<8x128xf32>,
    } else {
    }
    %c0 = arith.constant 0 : index
    %c0_1 = arith.constant 0 : index
    %3 = vector.load %arg1[%c0, %c0_1] : memref<8x128xbf16, #tpu.memory_space<vmem>>, vector<8x128xbf16>
    %c0_2 = arith.constant 0 : index
    %c0_3 = arith.constant 0 : index
    %4 = vector.load %arg4[%c0_2, %c0_3] : memref<128x128xbf16, #tpu.memory_space<vmem>>, vector<128x128xbf16>
    %cst = arith.constant dense<0.000000e+00> : vector<8x128xf32>
    %5 = tpu.matmul %3, %4, %cst {dimension_numbers = #tpu.dot_dimension_numbers<[1], [0], [0], [1], [0, 0, 1, 1], [], []>} : vector<8x128xbf16>, vector<128x128xbf16>, vector<8x128xf32> -> vector<8x128xf32>
    %c0_4 = arith.constant 0 : index
    %c0_5 = arith.constant 0 : index
    %6 = vector.load %arg5[%c0_4, %c0_5] : memref<1x128xf32, #tpu.memory_space<vmem>>, vector<1x128xf32>
    %7 = vector.broadcast %6 : vector<1x128xf32> to vector<8x128xf32>
    %8 = arith.addf %5, %7 : vector<8x128xf32>
    %cst_6 = arith.constant 0.000000e+00 : f32
    %9 = vector.broadcast %cst_6 : f32 to vector<8x128xf32>
    %10 = arith.maximumf %8, %9 : vector<8x128xf32>
    %11 = arith.truncf %10 : vector<8x128xf32> to vector<8x128xbf16>
    %c0_7 = arith.constant 0 : index
    %c0_8 = arith.constant 0 : index
    %12 = vector.load %arg6[%c0_7, %c0_8] : memref<128x128xbf16, #tpu.memory_space<vmem>>, vector<128x128xbf16>
    %cst_9 = arith.constant dense<0.000000e+00> : vector<8x128xf32>
    %13 = tpu.matmul %11, %12, %cst_9 {dimension_numbers = #tpu.dot_dimension_numbers<[1], [0], [0], [1], [0, 0, 1, 1], [], []>} : vector<8x128xbf16>, vector<128x128xbf16>, vector<8x128xf32> -> vector<8x128xf32>
    %c0_10 = arith.constant 0 : index
    %c0_11 = arith.constant 0 : index
    %14 = vector.load %arg7[%c0_10, %c0_11] : memref<1x128xf32, #tpu.memory_space<vmem>>, vector<1x128xf32>
    %15 = vector.broadcast %14 : vector<1x128xf32> to vector<8x128xf32>
    %16 = arith.addf %13, %15 : vector<8x128xf32>
    %cst_12 = arith.constant 0.000000e+00 : f32
    %17 = vector.broadcast %cst_12 : f32 to vector<8x128xf32>
    %18 = arith.maximumf %16, %17 : vector<8x128xf32>
    %19 = arith.truncf %18 : vector<8x128xf32> to vector<8x128xbf16>
    %c0_13 = arith.constant 0 : index
    %c0_14 = arith.constant 0 : index
    %20 = vector.load %arg8[%c0_13, %c0_14] : memref<128x128xbf16, #tpu.memory_space<vmem>>, vector<128x128xbf16>
    %cst_15 = arith.constant dense<0.000000e+00> : vector<8x128xf32>
    %21 = tpu.matmul %19, %20, %cst_15 {dimension_numbers = #tpu.dot_dimension_numbers<[1], [0], [0], [1], [0, 0, 1, 1], [], []>} : vector<8x128xbf16>, vector<128x128xbf16>, vector<8x128xf32> -> vector<8x128xf32>
    %c0_16 = arith.constant 0 : index
    %c0_17 = arith.constant 0 : index
    %22 = vector.load %arg9[%c0_16, %c0_17] : memref<1x128xf32, #tpu.memory_space<vmem>>, vector<1x128xf32>
    %23 = vector.broadcast %22 : vector<1x128xf32> to vector<8x128xf32>
    %24 = arith.addf %21, %23 : vector<8x128xf32>
    %cst_18 = arith.constant 0.000000e+00 : f32
    %25 = vector.broadcast %cst_18 : f32 to vector<8x128xf32>
    %26 = arith.maximumf %24, %25 : vector<8x128xf32>
    %27 = arith.truncf %26 : vector<8x128xf32> to vector<8x128xbf16>
    %c0_19 = arith.constant 0 : index
    %c0_20 = arith.constant 0 : index
    %28 = vector.load %arg10[%c0_19, %c0_20] : memref<128x128xbf16, #tpu.memory_space<vmem>>, vector<128x128xbf16>
    %cst_21 = arith.constant dense<0.000000e+00> : vector<8x128xf32>
    %29 = tpu.matmul %27, %28, %cst_21 {dimension_numbers = #tpu.dot_dimension_numbers<[1], [0], [0], [1], [0, 0, 1, 1], [], []>} : vector<8x128xbf16>, vector<128x128xbf16>, vector<8x128xf32> -> vector<8x128xf32>
    %c0_22 = arith.constant 0 : index
    %c0_23 = arith.constant 0 : index
    %30 = vector.load %arg11[%c0_22, %c0_23] : memref<1x128xf32, #tpu.memory_space<vmem>>, vector<1x128xf32>
    %31 = vector.broadcast %30 : vector<1x128xf32> to vector<8x128xf32>
    %32 = arith.addf %29, %31 : vector<8x128xf32>
    %cst_24 = arith.constant 0.000000e+00 : f32
    %33 = vector.broadcast %cst_24 : f32 to vector<8x128xf32>
    %34 = arith.maximumf %32, %33 : vector<8x128xf32>
    %35 = arith.truncf %34 : vector<8x128xf32> to vector<8x128xbf16>
    %c0_25 = arith.constant 0 : index
    %c0_26 = arith.constant 0 : index
    %36 = vector.load %arg12[%c0_25, %c0_26] : memref<128x128xbf16, #tpu.memory_space<vmem>>, vector<128x128xbf16>
    %cst_27 = arith.constant dense<0.000000e+00> : vector<8x128xf32>
    %37 = tpu.matmul %35, %36, %cst_27 {dimension_numbers = #tpu.dot_dimension_numbers<[1], [0], [0], [1], [0, 0, 1, 1], [], []>} : vector<8x128xbf16>, vector<128x128xbf16>, vector<8x128xf32> -> vector<8x128xf32>
    %c0_28 = arith.constant 0 : index
    %c0_29 = arith.constant 0 : index
    %38 = vector.load %arg13[%c0_28, %c0_29] : memref<1x128xf32, #tpu.memory_space<vmem>>, vector<1x128xf32>
    %39 = vector.broadcast %38 : vector<1x128xf32> to vector<8x128xf32>
    %40 = arith.addf %37, %39 : vector<8x128xf32>
    %cst_30 = arith.constant 0.000000e+00 : f32
    %41 = vector.broadcast %cst_30 : f32 to vector<8x128xf32>
    %42 = arith.maximumf %40, %41 : vector<8x128xf32>
    %c0_31 = arith.constant 0 : index
    %c0_32 = arith.constant 0 : index
    %43 = vector.load %arg2[%c0_31, %c0_32] : memref<8x1xi32, #tpu.memory_space<vmem>>, vector<8x1xi32>
    %44 = tpu.iota {dimensions = array<i32: 1>} : vector<8x8xi32>
    %45 = vector.broadcast %43 : vector<8x1xi32> to vector<8x8xi32>
    %46 = arith.cmpi eq, %44, %45 : vector<8x8xi32>
    %c0_33 = arith.constant 0 : index
    %c0_34 = arith.constant 0 : index
    %47 = vector.load %arg3[%c0_33, %c0_34] : memref<1x8xf32, #tpu.memory_space<vmem>>, vector<1x8xf32>
    %cst_35 = arith.constant 0.000000e+00 : f32
    %48 = vector.shape_cast %47 : vector<1x8xf32> to vector<1x8xf32>
    %49 = vector.broadcast %48 : vector<1x8xf32> to vector<8x8xf32>
    %50 = vector.broadcast %cst_35 : f32 to vector<8x8xf32>
    %51 = arith.select %46, %49, %50 : vector<8x8xi1>, vector<8x8xf32>
    %c0_36 = arith.constant 0 : index
    %c0_37 = arith.constant 0 : index
    %52 = vector.load %arg14[%c0_36, %c0_37] : memref<8x128xf32, #tpu.memory_space<vmem>>, vector<8x128xf32>
    %cst_38 = arith.constant dense<0.000000e+00> : vector<8x128xf32>
    %53 = tpu.matmul %51, %42, %cst_38 {dimension_numbers = #tpu.dot_dimension_numbers<[0], [0], [1], [1], [0, 1, 1, 1], [], []>} : vector<8x8xf32>, vector<8x128xf32>, vector<8x128xf32> -> vector<8x128xf32>
    %54 = arith.addf %52, %53 : vector<8x128xf32>
    %c0_39 = arith.constant 0 : index
    %c0_40 = arith.constant 0 : index
    %55 = vector.load %arg14[%c0_39, %c0_40] : memref<8x128xf32, #tpu.memory_space<vmem>>, vector<8x128xf32>
    tpu.vector_store %arg14[%c0_39, %c0_40], %54 {strides = array<i32>} : memref<8x128xf32, #tpu.memory_space<vmem>>, vector<8x128xf32>,
    return
  }
  func.func @transform_0(%arg0: i32) -> (i32, i32) {
    %c0_i32 = arith.constant 0 : i32
    %c0_i32_0 = arith.constant 0 : i32
    return %arg0, %c0_i32 : i32, i32
  }
  func.func @transform_1(%arg0: i32) -> (i32, i32) {
    %c0_i32 = arith.constant 0 : i32
    %c0_i32_0 = arith.constant 0 : i32
    return %arg0, %c0_i32 : i32, i32
  }
  func.func @transform_2(%arg0: i32) -> (i32, i32) {
    %c0_i32 = arith.constant 0 : i32
    %c0_i32_0 = arith.constant 0 : i32
    %c0_i32_1 = arith.constant 0 : i32
    return %c0_i32, %c0_i32_0 : i32, i32
  }
  func.func @transform_3(%arg0: i32) -> (i32, i32) {
    %c0_i32 = arith.constant 0 : i32
    %c0_i32_0 = arith.constant 0 : i32
    %c0_i32_1 = arith.constant 0 : i32
    return %c0_i32, %c0_i32_0 : i32, i32
  }
  func.func @transform_4(%arg0: i32) -> (i32, i32) {
    %c0_i32 = arith.constant 0 : i32
    %c0_i32_0 = arith.constant 0 : i32
    %c0_i32_1 = arith.constant 0 : i32
    return %c0_i32, %c0_i32_0 : i32, i32
  }
  func.func @transform_5(%arg0: i32) -> (i32, i32) {
    %c0_i32 = arith.constant 0 : i32
    %c0_i32_0 = arith.constant 0 : i32
    %c0_i32_1 = arith.constant 0 : i32
    return %c0_i32, %c0_i32_0 : i32, i32
  }
  func.func @transform_6(%arg0: i32) -> (i32, i32) {
    %c0_i32 = arith.constant 0 : i32
    %c0_i32_0 = arith.constant 0 : i32
    %c0_i32_1 = arith.constant 0 : i32
    return %c0_i32, %c0_i32_0 : i32, i32
  }
  func.func @transform_7(%arg0: i32) -> (i32, i32) {
    %c0_i32 = arith.constant 0 : i32
    %c0_i32_0 = arith.constant 0 : i32
    %c0_i32_1 = arith.constant 0 : i32
    return %c0_i32, %c0_i32_0 : i32, i32
  }
  func.func @transform_8(%arg0: i32) -> (i32, i32) {
    %c0_i32 = arith.constant 0 : i32
    %c0_i32_0 = arith.constant 0 : i32
    %c0_i32_1 = arith.constant 0 : i32
    return %c0_i32, %c0_i32_0 : i32, i32
  }
  func.func @transform_9(%arg0: i32) -> (i32, i32) {
    %c0_i32 = arith.constant 0 : i32
    %c0_i32_0 = arith.constant 0 : i32
    %c0_i32_1 = arith.constant 0 : i32
    return %c0_i32, %c0_i32_0 : i32, i32
  }
  func.func @transform_10(%arg0: i32) -> (i32, i32) {
    %c0_i32 = arith.constant 0 : i32
    %c0_i32_0 = arith.constant 0 : i32
    %c0_i32_1 = arith.constant 0 : i32
    return %c0_i32, %c0_i32_0 : i32, i32
  }
  func.func @transform_11(%arg0: i32) -> (i32, i32) {
    %c0_i32 = arith.constant 0 : i32
    %c0_i32_0 = arith.constant 0 : i32
    %c0_i32_1 = arith.constant 0 : i32
    return %c0_i32, %c0_i32_0 : i32, i32
  }
  func.func @transform_12(%arg0: i32) -> (i32, i32) {
    %c0_i32 = arith.constant 0 : i32
    %c0_i32_0 = arith.constant 0 : i32
    %c0_i32_1 = arith.constant 0 : i32
    return %c0_i32, %c0_i32_0 : i32, i32
  }
  func.func @transform_13(%arg0: i32) -> (i32, i32) {
    %c0_i32 = arith.constant 0 : i32
    %c0_i32_0 = arith.constant 0 : i32
    %c0_i32_1 = arith.constant 0 : i32
    return %c0_i32, %c0_i32_0 : i32, i32
  }
}

</mosaic_0001>

<bundles_post_ra>
// kernel: _lambda_.1
= control target key start
LH: loop header
LB: loop body
LE: loop exit
PB: predicated region body
PF: predicated region fallthrough
CT: control target
= control target key end

     0   :  { %s1518_s25 = smov 0   ;;  %s1741_s0 = inlined_call_operand.vmem [shape: bf16[16,128], index: 0, kind: input, shape index: {}]   ;;  %s1742_s1 = inlined_call_operand.vmem [shape: s32[16,1], index: 1, kind: input, shape index: {}]   ;;  %s1743_s2 = inlined_call_operand.vmem [shape: f32[1,8], index: 2, kind: input, shape index: {}]   ;;  %s1744_s3 = inlined_call_operand.vmem [shape: bf16[128,128], index: 3, kind: input, shape index: {}]   ;;  %s1745_s4 = inlined_call_operand.vmem [shape: f32[1,128], index: 4, kind: input, shape index: {}]   ;;  %s1746_s5 = inlined_call_operand.vmem [shape: bf16[128,128], index: 5, kind: input, shape index: {}]   ;;  %s1747_s6 = inlined_call_operand.vmem [shape: f32[1,128], index: 6, kind: input, shape index: {}]   ;;  %s1748_s7 = inlined_call_operand.vmem [shape: bf16[128,128], index: 7, kind: input, shape index: {}]   ;;  %s1749_s8 = inlined_call_operand.vmem [shape: f32[1,128], index: 8, kind: input, shape index: {}]   ;;  %s1750_s9 = inlined_call_operand.vmem [shape: bf16[128,128], index: 9, kind: input, shape index: {}]   ;;  %s1751_s10 = inlined_call_operand.vmem [shape: f32[1,128], index: 10, kind: input, shape index: {}]   ;;  %s1752_s11 = inlined_call_operand.vmem [shape: bf16[128,128], index: 11, kind: input, shape index: {}]   ;;  %s1753_s12 = inlined_call_operand.vmem [shape: f32[1,128], index: 12, kind: input, shape index: {}]   ;;  %s1754_s13 = inlined_call_operand.vmem [shape: f32[8,128], index: 13, kind: output, shape index: {}]  }
   0x1 LB: > { %s1175_s26 = sadd.s32 4294967295, %s1442_s25   ;;  %p1178_p0 = scmp.ge.s32.totalorder %s1442_s25, 1  ;;  %s1442_s25 = sphi %s1518_s25, %s23_s25  }
   0x2   : > { %p390_p1 = scmp.lt.s32.totalorder %s1442_s25, 3 }
   0x4   : > { %p391_p2 = pnand %p1178_p0, %p390_p1 }
   0x5   : > { %p432_p3 = scmp.lt.s32.totalorder (!%p391_p2), %s1175_s26, 1  ;;  %p1181_p4 = scmp.ne.s32.totalorder (!%p391_p2), %s1175_s26, 0 }
   0x6   : > { %394 = sbr.rel (%p391_p2) target bundleno = 1358 (0x54e), region = 72 }
   0xd   : > { %s433_s27 = scalar_select %p432_p3, %s1175_s26, 1 }
   0xe   : > { %444 = sbr.rel (%p1181_p4) target bundleno = 21 (0x15), region = 76  ;;  %v1444_v0 = vmov (!%p1181_p4), 0.0  }
   0xf   : > { %s1179_s28 = sshll.u32 %s433_s27, 2  ;;  %s1180_s29 = sshll.u32 %s433_s27, 3  ;;  %445 = vst [vmem:[%s1754_s13] sm:$0xff] (!%p1181_p4), %v1444_v0 }
  0x10   : > { %s1529_s15 = scalar_lea.vmem %s1741_s0, %s1179_s28  ;;  %s1534_s18 = scalar_lea.vmem %s1742_s1, %s1180_s29 }
  0x15 PF: > { %v1396_v1 = vld [vmem:[%s1744_s3] sm:$0xff]   ;;  %v1445_v2 = vmov 0.0   ;;  %v1397_v3 = vld [vmem:[%s1744_s3 + $0x8] sm:$0xff]   ;;  %vm1446_vm0 = vmmov 0   ;;  %v1398_v4 = vld [vmem:[%s1744_s3 + $0x10] sm:$0xff]   ;;  %v1447_v53 = vmov 0  }
  0x16   : > { %1278 = vmatprep.subr.bf16.mxu0 %v1445_v2  ;;  %1298 = vmatprep.subr.bf16.mxu1 %v1445_v2  ;;  %v1404_v5 = vld [vmem:[%s1746_s5] sm:$0xff]   ;;  %v1399_v6 = vld [vmem:[%s1744_s3 + $0x18] sm:$0xff]   ;;  %v1405_v7 = vld [vmem:[%s1746_s5 + $0x8] sm:$0xff]   ;;  %vm1059_vm2 = vcmask 64512  }
  0x17   : > { %1279 = vmatpush3.bf16.msra.mxu0 %v1396_v1  ;;  %1294 = vmatprep.mubr.msk.bf16.mxu0 %vm1446_vm0, %v1445_v2  ;;  %v1400_v8 = vld [vmem:[%s1744_s3 + $0x20] sm:$0xff]   ;;  %v1406_v9 = vld [vmem:[%s1746_s5 + $0x10] sm:$0xff]   ;;  %v1401_v10 = vld [vmem:[%s1744_s3 + $0x28] sm:$0xff]  }
  0x18   : > { %1280 = vmatprep.subr.bf16.mxu0 %v1445_v2  ;;  %1314 = vmatprep.mubr.msk.bf16.mxu1 %vm1446_vm0, %v1445_v2  ;;  %v1407_v11 = vld [vmem:[%s1746_s5 + $0x18] sm:$0xff]   ;;  %v1402_v12 = vld [vmem:[%s1744_s3 + $0x30] sm:$0xff]   ;;  %v1408_v13 = vld [vmem:[%s1746_s5 + $0x20] sm:$0xff]  }
  0x19   : > { %1299 = vmatpush3.bf16.msra.mxu1 %v1404_v5  ;;  %v1403_v14 = vld [vmem:[%s1744_s3 + $0x38] sm:$0xff]   ;;  %v1409_v15 = vld [vmem:[%s1746_s5 + $0x28] sm:$0xff]   ;;  %v446_v16 = vld [vmem:[%s1529_s15] sm:$0xf]  ;;  %1395 = vset.pattern.permute.xlu0 %v1447_v53 }
  0x1a   : > { %1300 = vmatprep.subr.bf16.mxu1 %v1445_v2  ;;  %v1410_v17 = vld [vmem:[%s1746_s5 + $0x30] sm:$0xff]   ;;  %v1411_v18 = vld [vmem:[%s1746_s5 + $0x38] sm:$0xff]   ;;  %v1412_v19 = vld [vmem:[%s1748_s7] sm:$0xff]  }
  0x1b   : > { %1281 = vmatpush3.bf16.msra.mxu0 %v1397_v3  ;;  %v1413_v20 = vld [vmem:[%s1748_s7 + $0x8] sm:$0xff]   ;;  %v1414_v21 = vld [vmem:[%s1748_s7 + $0x10] sm:$0xff]   ;;  %v1415_v22 = vld [vmem:[%s1748_s7 + $0x18] sm:$0xff]  }
  0x1c   : > { %1282 = vmatprep.subr.bf16.mxu0 %v1445_v2  ;;  %v1416_v23 = vld [vmem:[%s1748_s7 + $0x20] sm:$0xff]   ;;  %v1417_v24 = vld [vmem:[%s1748_s7 + $0x28] sm:$0xff]   ;;  %v1418_v33 = vld [vmem:[%s1748_s7 + $0x30] sm:$0xff]  }
  0x1d   : > { %1301 = vmatpush3.bf16.msra.mxu1 %v1405_v7  ;;  %v1182_v25 = vld [vmem:[%s1745_s4] ss:$0 sm:$0xff]  ;;  %v1419_v34 = vld [vmem:[%s1748_s7 + $0x38] sm:$0xff]   ;;  %v1421_v36 = vld [vmem:[%s1750_s9 + $0x8] sm:$0xff]  }
  0x1e   : > { %1302 = vmatprep.subr.bf16.mxu1 %v1445_v2  ;;  %v1420_v35 = vld [vmem:[%s1750_s9] sm:$0xff]   ;;  %v1422_v37 = vld [vmem:[%s1750_s9 + $0x10] sm:$0xff]   ;;  %v1423_v38 = vld [vmem:[%s1750_s9 + $0x18] sm:$0xff]  }
  0x1f   : > { %1283 = vmatpush3.bf16.msra.mxu0 %v1398_v4  ;;  %v1424_v39 = vld [vmem:[%s1750_s9 + $0x20] sm:$0xff]   ;;  %v1425_v40 = vld [vmem:[%s1750_s9 + $0x28] sm:$0xff]   ;;  %v1426_v49 = vld [vmem:[%s1750_s9 + $0x30] sm:$0xff]  }
  0x20   : > { %1284 = vmatprep.subr.bf16.mxu0 %v1445_v2  ;;  %v1191_v41 = vld [vmem:[%s1747_s6] ss:$0 sm:$0xff]  ;;  %v1427_v50 = vld [vmem:[%s1750_s9 + $0x38] sm:$0xff]   ;;  %v1429_v54 = vld [vmem:[%s1752_s11 + $0x8] sm:$0xff]  }
  0x21   : > { %1303 = vmatpush3.bf16.msra.mxu1 %v1406_v9  ;;  %v1011_v51 = vld [vmem:[%s1534_s18] sm:$0xff]  ;;  %v1430_v55 = vld [vmem:[%s1752_s11 + $0x10] sm:$0xff]   ;;  %v1431_v56 = vld [vmem:[%s1752_s11 + $0x18] sm:$0xff]  }
  0x22   : > { %1304 = vmatprep.subr.bf16.mxu1 %v1445_v2  ;;  %v1428_v52 = vld [vmem:[%s1752_s11] sm:$0xff]   ;;  %1015 = vperm.xlu0 %1395, %v1011_v51   ;;  %v1433_v58 = vld [vmem:[%s1752_s11 + $0x28] sm:$0xff]   ;;  %v1434_v4 = vld [vmem:[%s1752_s11 + $0x30] sm:$0xff]  }
  0x23   : > { %1285 = vmatpush3.bf16.msra.mxu0 %v1399_v6  ;;  %v1432_v57 = vld [vmem:[%s1752_s11 + $0x20] sm:$0xff]   ;;  %v1435_v5 = vld [vmem:[%s1752_s11 + $0x38] sm:$0xff]   ;;  %v1012_v6 = vlaneseq }
  0x24   : > { %1286 = vmatprep.subr.bf16.mxu0 %v1445_v2  ;;  %v1200_v59 = vld [vmem:[%s1749_s8] ss:$0 sm:$0xff] }
  0x25   : > { %1305 = vmatpush3.bf16.msra.mxu1 %v1407_v11  ;;  %v1227_v9 = vld [vmem:[%s1743_s2] ss:$0 sm:$0xff] }
  0x26   : > { %1306 = vmatprep.subr.bf16.mxu1 %v1445_v2  ;;  %v1209_v11 = vld [vmem:[%s1751_s10] ss:$0 sm:$0xff] }
  0x27   : > { %1287 = vmatpush3.bf16.msra.mxu0 %v1400_v8  ;;  %v1013_v8 = vand.u32 127, %v1012_v6 }
  0x28   : > { %1288 = vmatprep.subr.bf16.mxu0 %v1445_v2 }
  0x29   : > { %1307 = vmatpush3.bf16.msra.mxu1 %v1408_v13 }
  0x2a   : > { %1308 = vmatprep.subr.bf16.mxu1 %v1445_v2 }
  0x2b   : > { %1289 = vmatpush3.bf16.msra.mxu0 %v1401_v10 }
  0x2c   : > { %1290 = vmatprep.subr.bf16.mxu0 %v1445_v2 }
  0x2d   : > { %1309 = vmatpush3.bf16.msra.mxu1 %v1409_v15 }
  0x2e   : > { %1310 = vmatprep.subr.bf16.mxu1 %v1445_v2 }
  0x2f   : > { %1291 = vmatpush3.bf16.msra.mxu0 %v1402_v12 }
  0x30   : > { %1292 = vmatprep.subr.bf16.mxu0 %v1445_v2 }
  0x31   : > { %1311 = vmatpush3.bf16.msra.mxu1 %v1410_v17 }
  0x32   : > { %1312 = vmatprep.subr.bf16.mxu1 %v1445_v2 }
  0x33   : > { %1293 = vmatpush3.bf16.msra.mxu0 %v1403_v14 }
  0x34   : > { %1318 = vmatprep.subr.bf16.mxu0 %v1445_v2 }
  0x35   : > { %1313 = vmatpush3.bf16.msra.mxu1 %v1411_v18  ;;  %v1218_v18 = vld [vmem:[%s1753_s12] ss:$0 sm:$0xff] }
  0x36   : > { %1295 = vmatmul.mubr.bf16.vlgmr.msra.gmra.mrb[0].mxu0 %v446_v16  ;;  %1338 = vmatprep.subr.bf16.mxu1 %v1445_v2 }
  0x37   : > { %1334 = vmatprep.mubr.msk.bf16.mxu0 %vm1446_vm0, %v1445_v2  ;;  %1319 = vmatpush3.bf16.msra.mxu0 %v1412_v19 }
  0x38   : > { %1320 = vmatprep.subr.bf16.mxu0 %v1445_v2 }
  0x3b   : > { %1321 = vmatpush3.bf16.msra.mxu0 %v1413_v20 }
  0x3c   : > { %1322 = vmatprep.subr.bf16.mxu0 %v1445_v2 }
  0x3f   : > { %1323 = vmatpush3.bf16.msra.mxu0 %v1414_v21 }
  0x40   : > { %1324 = vmatprep.subr.bf16.mxu0 %v1445_v2 }
  0x43   : > { %1325 = vmatpush3.bf16.msra.mxu0 %v1415_v22 }
  0x44   : > { %1326 = vmatprep.subr.bf16.mxu0 %v1445_v2 }
  0x47   : > { %1327 = vmatpush3.bf16.msra.mxu0 %v1416_v23 }
  0x48   : > { %1328 = vmatprep.subr.bf16.mxu0 %v1445_v2 }
  0x4b   : > { %1329 = vmatpush3.bf16.msra.mxu0 %v1417_v24 }
  0x4c   : > { %1330 = vmatprep.subr.bf16.mxu0 %v1445_v2 }
  0x4f   : > { %1331 = vmatpush3.bf16.msra.mxu0 %v1418_v33 }
  0x50   : > { %1332 = vmatprep.subr.bf16.mxu0 %v1445_v2 }
  0x53   : > { %1333 = vmatpush3.bf16.msra.mxu0 %v1419_v34 }
  0x54   : > { %1358 = vmatprep.subr.bf16.mxu0 %v1445_v2 }
  0xa1   : > { %v1016_v7 = vpop.permute.xlu0 %1015 }
  0xa2   : > { %vm1017_vm1 = vcmp.eq.s32.totalorder %v1013_v8, %v1016_v7 }
  0xa3   : > { %v1025_v10 = vsel %vm1017_vm1, %v1227_v9, 0.0 }
  0xa4   : > { %1027 = vxpose.xlu0.b32.start.end [1/1] (short) (narrow) %v1025_v10, 8 }
 0x109   : > { %v552_v26 = vpop.f32.mrb[0].mxu0 }
 0x10a   : > { %v553_v27 = vadd.f32 %v1182_v25, %v552_v26  ;;  %v1296_v28 = vpop.f32.mrb[1].mxu0  ;;  %v1026_v26 = vld [vmem:[%s1754_s13] sm:$0xff] }
 0x10b   : > { %v555_v29 = vpop.f32.mrb[2].mxu0 }
 0x10c   : > { %v558_v30 = vmax.f32 %v553_v27, 0.0  ;;  %v1297_v31 = vpop.f32.mrb[3].mxu0 }
 0x10e   : > { %v559_v32 = vpack.c.bf16 %v558_v30, %v558_v30 }
 0x110   : > { %1315 = vmatmul.mubr.bf16.vlgmr.msra.gmra.mrb[0].mxu1 %v559_v32 }
 0x111   : > { %1354 = vmatprep.mubr.msk.bf16.mxu1 %vm1446_vm0, %v1445_v2  ;;  %1339 = vmatpush3.bf16.msra.mxu1 %v1420_v35 }
 0x112   : > { %1340 = vmatprep.subr.bf16.mxu1 %v1445_v2 }
 0x115   : > { %1341 = vmatpush3.bf16.msra.mxu1 %v1421_v36 }
 0x116   : > { %1342 = vmatprep.subr.bf16.mxu1 %v1445_v2 }
 0x119   : > { %1343 = vmatpush3.bf16.msra.mxu1 %v1422_v37 }
 0x11a   : > { %1344 = vmatprep.subr.bf16.mxu1 %v1445_v2 }
 0x11d   : > { %1345 = vmatpush3.bf16.msra.mxu1 %v1423_v38 }
 0x11e   : > { %1346 = vmatprep.subr.bf16.mxu1 %v1445_v2 }
 0x121   : > { %1347 = vmatpush3.bf16.msra.mxu1 %v1424_v39 }
 0x122   : > { %1348 = vmatprep.subr.bf16.mxu1 %v1445_v2 }
 0x124   : > { %v1043_v25 = vpop.trf.xlu0 }
 0x125   : > { %1349 = vmatpush3.bf16.msra.mxu1 %v1425_v40 }
 0x126   : > { %1350 = vmatprep.subr.bf16.mxu1 %v1445_v2 }
 0x129   : > { %1351 = vmatpush3.bf16.msra.mxu1 %v1426_v49 }
 0x12a   : > { %1352 = vmatprep.subr.bf16.mxu1 %v1445_v2 }
 0x12d   : > { %1353 = vmatpush3.bf16.msra.mxu1 %v1427_v50 }
 0x12e   : > { %1378 = vmatprep.subr.mxu1 %v1445_v2 }
 0x1e3   : > { %v665_v42 = vpop.f32.mrb[0].mxu1 }
 0x1e4   : > { %v666_v43 = vadd.f32 %v1191_v41, %v665_v42  ;;  %v1316_v44 = vpop.f32.mrb[1].mxu1 }
 0x1e5   : > { %v668_v45 = vpop.f32.mrb[2].mxu1 }
 0x1e6   : > { %v671_v46 = vmax.f32 %v666_v43, 0.0  ;;  %v1317_v47 = vpop.f32.mrb[3].mxu1 }
 0x1e8   : > { %v672_v48 = vpack.c.bf16 %v671_v46, %v671_v46 }
 0x1ea   : > { %1335 = vmatmul.mubr.bf16.vlgmr.msra.gmra.mrb[4].mxu0 %v672_v48 }
 0x1eb   : > { %1374 = vmatprep.mubr.msk.bf16.mxu0 %vm1446_vm0, %v1445_v2  ;;  %1359 = vmatpush3.bf16.msra.mxu0 %v1428_v52 }
 0x1ec   : > { %1360 = vmatprep.subr.bf16.mxu0 %v1445_v2 }
 0x1ef   : > { %1361 = vmatpush3.bf16.msra.mxu0 %v1429_v54 }
 0x1f0   : > { %1362 = vmatprep.subr.bf16.mxu0 %v1445_v2 }
 0x1f3   : > { %1363 = vmatpush3.bf16.msra.mxu0 %v1430_v55 }
 0x1f4   : > { %1364 = vmatprep.subr.bf16.mxu0 %v1445_v2 }
 0x1f7   : > { %1365 = vmatpush3.bf16.msra.mxu0 %v1431_v56 }
 0x1f8   : > { %1366 = vmatprep.subr.bf16.mxu0 %v1445_v2 }
 0x1fb   : > { %1367 = vmatpush3.bf16.msra.mxu0 %v1432_v57 }
 0x1fc   : > { %1368 = vmatprep.subr.bf16.mxu0 %v1445_v2 }
 0x1ff   : > { %1369 = vmatpush3.bf16.msra.mxu0 %v1433_v58 }
 0x200   : > { %1370 = vmatprep.subr.bf16.mxu0 %v1445_v2 }
 0x203   : > { %1371 = vmatpush3.bf16.msra.mxu0 %v1434_v4 }
 0x204   : > { %1372 = vmatprep.subr.bf16.mxu0 %v1445_v2 }
 0x207   : > { %1373 = vmatpush3.bf16.msra.mxu0 %v1435_v5 }
 0x2bd   : > { %v778_v60 = vpop.f32.mrb[4].mxu0 }
 0x2be   : > { %v779_v61 = vadd.f32 %v1200_v59, %v778_v60  ;;  %v1336_v62 = vpop.f32.mrb[5].mxu0 }
 0x2bf   : > { %v781_v63 = vpop.f32.mrb[6].mxu0 }
 0x2c0   : > { %v784_v0 = vmax.f32 %v779_v61, 0.0  ;;  %v1337_v1 = vpop.f32.mrb[7].mxu0 }
 0x2c2   : > { %v785_v3 = vpack.c.bf16 %v784_v0, %v784_v0 }
 0x2c4   : > { %1355 = vmatmul.mubr.bf16.vlgmr.msra.gmra.mrb[4].mxu1 %v785_v3 }
 0x2c5   : > { %1380 = vmatprep.mubr.msk.f32.mxu1 %vm1446_vm0, %v1445_v2 }
 0x397   : > { %v891_v2 = vpop.f32.mrb[4].mxu1 }
 0x398   : > { %v892_v12 = vadd.f32 %v1209_v11, %v891_v2  ;;  %v1356_v13 = vpop.f32.mrb[5].mxu1 }
 0x399   : > { %v894_v14 = vpop.f32.mrb[6].mxu1 }
 0x39a   : > { %v897_v15 = vmax.f32 %v892_v12, 0.0  ;;  %v1357_v16 = vpop.f32.mrb[7].mxu1 }
 0x39c   : > { %v898_v17 = vpack.c.bf16 %v897_v15, %v897_v15 }
 0x39e   : > { %1375 = vmatmul.mubr.bf16.vlgmr.msra.gmra.mrb[8].mxu0 %v898_v17 }
 0x471   : > { %v1004_v19 = vpop.f32.mrb[8].mxu0 }
 0x472   : > { %v1005_v20 = vadd.f32 %v1218_v18, %v1004_v19  ;;  %v1376_v21 = vpop.f32.mrb[9].mxu0 }
 0x473   : > { %v1007_v22 = vpop.f32.mrb[10].mxu0 }
 0x474   : > { %v1010_v23 = vmax.f32 %v1005_v20, 0.0  ;;  %v1377_v24 = vpop.f32.mrb[11].mxu0 }
 0x476   : > { %1379 = vmatpush3.msra.mxu1 %v1010_v23 }
 0x477   : > { %1381 = vmatmul.mubr.msk.f32.vlgmr.msra.gmra.mrb[8].mxu1 %vm1059_vm2, %v1043_v25 }
 0x54a   : > { %v1129_v27 = vpop.f32.mrb[8].mxu1 }
 0x54b   : > { %v1133_v28 = vadd.f32 %v1129_v27, %v1026_v26  ;;  %v1382_v29 = vpop.f32.mrb[9].mxu1 }
 0x54d   : > { %1134 = vst [vmem:[%s1754_s13] sm:$0xff] %v1133_v28 }
 0x54e PF: > { %s23_s25 = sadd.s32 1, %s1442_s25  }
 0x54f   : > { %p20_p5 = scmp.ge.s32.totalorder %s23_s25, 4  }
 0x551   :  { %22 = sbr.rel (!%p20_p5) target bundleno = 1 (0x1), region = 105 }

</bundles_post_ra>
